<compile_context>
chip_gen: v6e
topology: v6e:2x2x1
jax: 0.10.0
libtpu: 0.0.40
codegen_flags: <defaults>
</compile_context>

<pallas_src>
import jax
import jax.numpy as jnp
from jax import lax
from jax.experimental import pallas as pl
from jax.experimental.pallas import tpu as pltpu
import numpy as np

_GATHER_UNROLL = 8  # static unroll of the per-row gather loops (TR is always a multiple of 8)


def _apply_rotary(e, cos_ref, sin_even_ref, sin_odd_ref):
    """out[:,2i] = e[:,2i]*cos - e[:,2i+1]*sin ; out[:,2i+1] = e[:,2i+1]*cos + e[:,2i]*sin."""
    D = e.shape[-1]
    e_next = pltpu.roll(e, D - 1, axis=1)   # e_next[:, k] = e[:, (k+1) % D]
    e_prev = pltpu.roll(e, 1, axis=1)       # e_prev[:, k] = e[:, (k-1) % D]
    # Wrap lanes (e_next at odd lanes, e_prev at even lanes) are zeroed by the tables.
    return e * cos_ref[...] + e_next * sin_even_ref[...] + e_prev * sin_odd_ref[...]


# ----------------------------- path A: VMEM-resident table ----------------------------- #

def _embed_rope_resident_kernel(ids_ref, cos_ref, sin_e_ref, sin_o_ref, emb_ref, out_ref):
    # ids_ref : (N,)    int32 SMEM (scalar prefetch), row-major (b, s)
    # cos_ref, sin_e_ref, sin_o_ref : (TR, D) VMEM, constant index_map (resident)
    # emb_ref : (V, D)  VMEM, constant index_map (resident) -- full embedding table
    # out_ref : (TR, D) VMEM output tile
    t = pl.program_id(0)
    TR, D = out_ref.shape
    base = t * TR

    # Gather: dynamic VMEM row loads straight into the output tile (no scratch, no DMA).
    @pl.loop(0, TR, step=_GATHER_UNROLL)
    def _gather(r0):
        for u in range(_GATHER_UNROLL):          # static partial unroll
            r = r0 + u
            tok = ids_ref[base + r]
            out_ref[pl.ds(r, 1), :] = emb_ref[pl.ds(tok, 1), :]

    out_ref[...] = _apply_rotary(out_ref[...], cos_ref, sin_e_ref, sin_o_ref)


# ----------------------------- path B: table stays in HBM ------------------------------ #

def _embed_rope_hbm_kernel(ids_ref, cos_ref, sin_e_ref, sin_o_ref, emb_hbm, out_ref, buf, sem):
    # emb_hbm : (V, D) in HBM (memory_space=pl.ANY)
    # buf     : (2, TR, D) VMEM scratch -- double-buffered gathered rows
    # sem     : (2,) DMA semaphores, one per slot
    s = pl.program_id(0)       # "parallel" slice axis (feeds both v7x TensorCores)
    i = pl.program_id(1)       # "arbitrary" tile axis within the slice
    tps = pl.num_programs(1)
    TR, D = out_ref.shape
    tile = s * tps + i
    slot = i % 2

    def issue(tile_idx, slot_idx):
        base = tile_idx * TR

        @pl.loop(0, TR, step=_GATHER_UNROLL)
        def _issue(r0):
            for u in range(_GATHER_UNROLL):      # static partial unroll of descriptor issue
                r = r0 + u
                tok = ids_ref[base + r]
                pltpu.make_async_copy(
                    emb_hbm.at[pl.ds(tok, 1)],
                    buf.at[slot_idx, pl.ds(r, 1)],
                    sem.at[slot_idx],
                ).start()

    # Prime the pipeline on the first tile of this slice.
    @pl.when(i == 0)
    def _prime():
        issue(tile, slot)

    # One bulk wait for all TR row copies of this slot: each copy signals D*itemsize
    # bytes on sem[slot]; this descriptor waits for TR*D*itemsize bytes in one op.
    pltpu.make_async_copy(emb_hbm.at[pl.ds(0, TR)], buf.at[slot], sem.at[slot]).wait()

    # Prefetch the next tile of this slice into the other slot while we compute.
    @pl.when(i + 1 < tps)
    def _prefetch():
        issue(tile + 1, 1 - slot)

    out_ref[...] = _apply_rotary(buf[slot], cos_ref, sin_e_ref, sin_o_ref)


# --------------------------------------- wrapper --------------------------------------- #

def _pick_sentences_per_tile(B, S, rows_target):
    """Largest bt dividing B with (bt*S) % 8 == 0, preferring bt*S <= rows_target and
    at least 2 tiles (so v7x's two TensorCores both get grid steps)."""
    cands = [bt for bt in range(1, B + 1) if B % bt == 0 and (bt * S) % 8 == 0]
    if not cands:
        return None
    rows_target = max(rows_target, S)
    pref = [bt for bt in cands if bt * S <= rows_target and B // bt >= 2]
    if pref:
        return max(pref)
    pref = [bt for bt in cands if bt * S <= rows_target]
    if pref:
        return max(pref)
    return min(cands)


def _rotary_tables(S, D, dtype):
    """Interleaved rotary tables with the pair-swap signs folded in."""
    inv_freq = 1.0 / (10000.0 ** (jnp.arange(0, D, 2, dtype=jnp.float32) / D))
    pos = jnp.arange(S, dtype=jnp.float32)
    freqs = pos[:, None] * inv_freq[None, :]                      # (S, D//2)
    cos_i = jnp.repeat(jnp.cos(freqs), 2, axis=-1)                # (S, D) interleaved
    sin_i = jnp.repeat(jnp.sin(freqs), 2, axis=-1)
    even_lane = (jnp.arange(D) % 2) == 0
    sin_even = jnp.where(even_lane, -sin_i, 0.0)                  # multiplies e_next
    sin_odd = jnp.where(even_lane, 0.0, sin_i)                    # multiplies e_prev
    return cos_i.astype(dtype), sin_even.astype(dtype), sin_odd.astype(dtype)


def sentence_embedding(token_ids, emb_table, *, rows_per_tile=1024,
                       table_vmem_budget_bytes=16 * 1024 * 1024,
                       force_hbm_table=False):
    """token_ids: (B, S) int, emb_table: (V, D) float -> (B, S, D) float."""
    orig_B, S = token_ids.shape
    V, D = emb_table.shape
    assert D % 2 == 0
    dtype = emb_table.dtype

    # Clamp ids so out-of-range tokens can't become OOB gathers (nn.Embedding would error).
    ids = jnp.clip(token_ids.astype(jnp.int32), 0, V - 1)

    # Sentence-aligned row tiles; pad the batch (instead of one giant block) if the row
    # count can't otherwise be made a multiple of 8.
    B = orig_B
    bt = _pick_sentences_per_tile(B, S, rows_per_tile)
    if bt is None:
        B = ((orig_B + 7) // 8) * 8
        ids = jnp.concatenate([ids, jnp.zeros((B - orig_B, S), jnp.int32)], axis=0)
        bt = _pick_sentences_per_tile(B, S, rows_per_tile)
    TR = bt * S
    num_tiles = B // bt
    N = B * S

    cos_sd, sin_e_sd, sin_o_sd = _rotary_tables(S, D, dtype)
    cos_t = jnp.tile(cos_sd, (bt, 1))        # (TR, D), hoisted out of the kernel
    sin_e_t = jnp.tile(sin_e_sd, (bt, 1))
    sin_o_t = jnp.tile(sin_o_sd, (bt, 1))

    ids_flat = ids.reshape(-1)

    table_bytes = V * D * emb_table.dtype.itemsize
    resident = (table_bytes <= table_vmem_budget_bytes and not force_hbm_table) or (V < TR)

    if resident:
        out_flat = pl.pallas_call(
            _embed_rope_resident_kernel,
            out_shape=jax.ShapeDtypeStruct((N, D), dtype),
            grid_spec=pltpu.PrefetchScalarGridSpec(
                num_scalar_prefetch=1,
                grid=(num_tiles,),
                in_specs=[
                    pl.BlockSpec((TR, D), lambda t, _: (0, 0)),   # cos       (resident)
                    pl.BlockSpec((TR, D), lambda t, _: (0, 0)),   # sin_even  (resident)
                    pl.BlockSpec((TR, D), lambda t, _: (0, 0)),   # sin_odd   (resident)
                    pl.BlockSpec((V, D), lambda t, _: (0, 0)),    # full table in VMEM
                ],
                out_specs=pl.BlockSpec((TR, D), lambda t, _: (t, 0)),
            ),
            compiler_params=pltpu.CompilerParams(
                dimension_semantics=("parallel",),
                vmem_limit_bytes=64 * 1024 * 1024,
            ),
        )(ids_flat, cos_t, sin_e_t, sin_o_t, emb_table)
    else:
        # Split the tile axis into (slices, tiles_per_slice): outer axis "parallel"
        # (megacore-safe), inner axis "arbitrary" so the cross-step DMA prefetch is
        # legal within each slice.
        ns = 2 if (num_tiles >= 4 and num_tiles % 2 == 0) else 1
        tps = num_tiles // ns
        out_flat = pl.pallas_call(
            _embed_rope_hbm_kernel,
            out_shape=jax.ShapeDtypeStruct((N, D), dtype),
            grid_spec=pltpu.PrefetchScalarGridSpec(
                num_scalar_prefetch=1,
                grid=(ns, tps),
                in_specs=[
                    pl.BlockSpec((TR, D), lambda s, i, _: (0, 0)),   # cos
                    pl.BlockSpec((TR, D), lambda s, i, _: (0, 0)),   # sin_even
                    pl.BlockSpec((TR, D), lambda s, i, _: (0, 0)),   # sin_odd
                    pl.BlockSpec(memory_space=pl.ANY),               # table stays in HBM
                ],
                out_specs=pl.BlockSpec((TR, D), lambda s, i, _: (s * tps + i, 0)),
                scratch_shapes=[
                    pltpu.VMEM((2, TR, D), dtype),                   # double-buffered rows
                    pltpu.SemaphoreType.DMA((2,)),                   # one sem per slot
                ],
            ),
            compiler_params=pltpu.CompilerParams(
                dimension_semantics=("parallel", "arbitrary"),
                vmem_limit_bytes=64 * 1024 * 1024,
            ),
        )(ids_flat, cos_t, sin_e_t, sin_o_t, emb_table)

    out = out_flat.reshape(B, S, D)
    if B != orig_B:
        out = out[:orig_B]
    return out


def _reference_forward(token_ids, emb_table):
    """Pure-JAX mirror of the PyTorch SentenceEmbedding.forward."""
    e = emb_table[token_ids]                                  # (B, S, D)
    B, S, D = e.shape
    inv_freq = 1.0 / (10000.0 ** (jnp.arange(0, D, 2, dtype=jnp.float32) / D))
    pos = jnp.arange(S, dtype=jnp.float32)
    freqs = pos[:, None] * inv_freq[None, :]                  # (S, D//2)
    sin = jnp.sin(freqs)[None]
    cos = jnp.cos(freqs)[None]
    x1 = e[..., ::2]
    x2 = e[..., 1::2]
    even = x1 * cos - x2 * sin
    odd = x1 * sin + x2 * cos
    return jnp.stack((even, odd), axis=-1).reshape(B, S, D)


if __name__ == "__main__":
    B, S = 8, 8
    VOCAB, EMBED_DIM = 512, 128

    key = jax.random.PRNGKey(0)
    k_ids, k_emb = jax.random.split(key)
    token_ids = jax.random.randint(k_ids, (B, S), 0, VOCAB, dtype=jnp.int32)
    # Deterministic synthetic embedding table (nn.Embedding(vocab_size, embed_dim).weight)
    emb_table = jax.random.normal(k_emb, (VOCAB, EMBED_DIM), dtype=jnp.float32)

    ref = jax.block_until_ready(_reference_forward(token_ids, emb_table))

    # Fast path: table resident in VMEM (512 x 128 f32 = 256 KiB), 2 parallel row tiles.
    out_resident = jax.block_until_ready(sentence_embedding(token_ids, emb_table))
    np.testing.assert_allclose(np.asarray(out_resident), np.asarray(ref), rtol=1e-5, atol=1e-5)

    # Large-vocab path: table kept in HBM, cross-step double-buffered row-DMA gather
    # (rows_per_tile=16 -> 4 tiles -> grid (2 slices, 2 tiles/slice)).
    out_hbm = jax.block_until_ready(
        sentence_embedding(token_ids, emb_table, rows_per_tile=16, force_hbm_table=True))
    np.testing.assert_allclose(np.asarray(out_hbm), np.asarray(ref), rtol=1e-5, atol=1e-5)

    print("KERNEL_OK")
</pallas_src>

<mosaic_0001>
module attributes {stable_mosaic.version = 11 : i64} {
  func.func @_embed_rope_resident_kernel(%arg0: i32, %arg1: memref<64xi32, #tpu.memory_space<smem>>, %arg2: memref<32x128xf32, #tpu.memory_space<vmem>>, %arg3: memref<32x128xf32, #tpu.memory_space<vmem>>, %arg4: memref<32x128xf32, #tpu.memory_space<vmem>>, %arg5: memref<512x128xf32, #tpu.memory_space<vmem>>, %arg6: memref<32x128xf32, #tpu.memory_space<vmem>>) attributes {dimension_semantics = [#tpu.dimension_semantics<parallel>], iteration_bounds = array<i64: 2>, scalar_prefetch = 1 : i64, scratch_operands = 0 : i64, tpu.core_type = #tpu.core_type<tc>, window_params = [{pipeline_mode = #tpu.pipeline_mode<synchronous>, transform_indices = @transform_0, window_bounds = array<i64: 32, 128>}, {pipeline_mode = #tpu.pipeline_mode<synchronous>, transform_indices = @transform_1, window_bounds = array<i64: 32, 128>}, {pipeline_mode = #tpu.pipeline_mode<synchronous>, transform_indices = @transform_2, window_bounds = array<i64: 32, 128>}, {pipeline_mode = #tpu.pipeline_mode<synchronous>, transform_indices = @transform_3, window_bounds = array<i64: 512, 128>}, {transform_indices = @transform_4, window_bounds = array<i64: 32, 128>}]} {
    %c32_i32 = arith.constant 32 : i32
    %0 = arith.muli %arg0, %c32_i32 : i32
    %c0_i32 = arith.constant 0 : i32
    %c4_i32 = arith.constant 4 : i32
    %1 = arith.addi %c0_i32, %c4_i32 : i32
    %c1_i32 = arith.constant 1 : i32
    scf.for %arg7 = %c0_i32 to %1 step %c1_i32  : i32 {
      %c8_i32 = arith.constant 8 : i32
      %14 = arith.muli %arg7, %c8_i32 : i32
      %c0_i32_11 = arith.constant 0 : i32
      %15 = arith.addi %c0_i32_11, %14 : i32
      %c0_i32_12 = arith.constant 0 : i32
      %16 = arith.addi %15, %c0_i32_12 : i32
      %17 = arith.addi %0, %16 : i32
      %18 = arith.index_cast %17 : i32 to index
      %19 = memref.load %arg1[%18] : memref<64xi32, #tpu.memory_space<smem>>
      %20 = arith.index_cast %19 : i32 to index
      %c0_13 = arith.constant 0 : index
      %21 = vector.load %arg5[%20, %c0_13] : memref<512x128xf32, #tpu.memory_space<vmem>>, vector<1x128xf32>
      %22 = arith.index_cast %16 : i32 to index
      %c0_14 = arith.constant 0 : index
      %23 = vector.load %arg6[%22, %c0_14] : memref<32x128xf32, #tpu.memory_space<vmem>>, vector<1x128xf32>
      tpu.vector_store %arg6[%22, %c0_14], %21 {strides = array<i32>} : memref<32x128xf32, #tpu.memory_space<vmem>>, vector<1x128xf32>,
      %c1_i32_15 = arith.constant 1 : i32
      %24 = arith.addi %15, %c1_i32_15 : i32
      %25 = arith.addi %0, %24 : i32
      %26 = arith.index_cast %25 : i32 to index
      %27 = memref.load %arg1[%26] : memref<64xi32, #tpu.memory_space<smem>>
      %28 = arith.index_cast %27 : i32 to index
      %c0_16 = arith.constant 0 : index
      %29 = vector.load %arg5[%28, %c0_16] : memref<512x128xf32, #tpu.memory_space<vmem>>, vector<1x128xf32>
      %30 = arith.index_cast %24 : i32 to index
      %c0_17 = arith.constant 0 : index
      %31 = vector.load %arg6[%30, %c0_17] : memref<32x128xf32, #tpu.memory_space<vmem>>, vector<1x128xf32>
      tpu.vector_store %arg6[%30, %c0_17], %29 {strides = array<i32>} : memref<32x128xf32, #tpu.memory_space<vmem>>, vector<1x128xf32>,
      %c2_i32 = arith.constant 2 : i32
      %32 = arith.addi %15, %c2_i32 : i32
      %33 = arith.addi %0, %32 : i32
      %34 = arith.index_cast %33 : i32 to index
      %35 = memref.load %arg1[%34] : memref<64xi32, #tpu.memory_space<smem>>
      %36 = arith.index_cast %35 : i32 to index
      %c0_18 = arith.constant 0 : index
      %37 = vector.load %arg5[%36, %c0_18] : memref<512x128xf32, #tpu.memory_space<vmem>>, vector<1x128xf32>
      %38 = arith.index_cast %32 : i32 to index
      %c0_19 = arith.constant 0 : index
      %39 = vector.load %arg6[%38, %c0_19] : memref<32x128xf32, #tpu.memory_space<vmem>>, vector<1x128xf32>
      tpu.vector_store %arg6[%38, %c0_19], %37 {strides = array<i32>} : memref<32x128xf32, #tpu.memory_space<vmem>>, vector<1x128xf32>,
      %c3_i32 = arith.constant 3 : i32
      %40 = arith.addi %15, %c3_i32 : i32
      %41 = arith.addi %0, %40 : i32
      %42 = arith.index_cast %41 : i32 to index
      %43 = memref.load %arg1[%42] : memref<64xi32, #tpu.memory_space<smem>>
      %44 = arith.index_cast %43 : i32 to index
      %c0_20 = arith.constant 0 : index
      %45 = vector.load %arg5[%44, %c0_20] : memref<512x128xf32, #tpu.memory_space<vmem>>, vector<1x128xf32>
      %46 = arith.index_cast %40 : i32 to index
      %c0_21 = arith.constant 0 : index
      %47 = vector.load %arg6[%46, %c0_21] : memref<32x128xf32, #tpu.memory_space<vmem>>, vector<1x128xf32>
      tpu.vector_store %arg6[%46, %c0_21], %45 {strides = array<i32>} : memref<32x128xf32, #tpu.memory_space<vmem>>, vector<1x128xf32>,
      %c4_i32_22 = arith.constant 4 : i32
      %48 = arith.addi %15, %c4_i32_22 : i32
      %49 = arith.addi %0, %48 : i32
      %50 = arith.index_cast %49 : i32 to index
      %51 = memref.load %arg1[%50] : memref<64xi32, #tpu.memory_space<smem>>
      %52 = arith.index_cast %51 : i32 to index
      %c0_23 = arith.constant 0 : index
      %53 = vector.load %arg5[%52, %c0_23] : memref<512x128xf32, #tpu.memory_space<vmem>>, vector<1x128xf32>
      %54 = arith.index_cast %48 : i32 to index
      %c0_24 = arith.constant 0 : index
      %55 = vector.load %arg6[%54, %c0_24] : memref<32x128xf32, #tpu.memory_space<vmem>>, vector<1x128xf32>
      tpu.vector_store %arg6[%54, %c0_24], %53 {strides = array<i32>} : memref<32x128xf32, #tpu.memory_space<vmem>>, vector<1x128xf32>,
      %c5_i32 = arith.constant 5 : i32
      %56 = arith.addi %15, %c5_i32 : i32
      %57 = arith.addi %0, %56 : i32
      %58 = arith.index_cast %57 : i32 to index
      %59 = memref.load %arg1[%58] : memref<64xi32, #tpu.memory_space<smem>>
      %60 = arith.index_cast %59 : i32 to index
      %c0_25 = arith.constant 0 : index
      %61 = vector.load %arg5[%60, %c0_25] : memref<512x128xf32, #tpu.memory_space<vmem>>, vector<1x128xf32>
      %62 = arith.index_cast %56 : i32 to index
      %c0_26 = arith.constant 0 : index
      %63 = vector.load %arg6[%62, %c0_26] : memref<32x128xf32, #tpu.memory_space<vmem>>, vector<1x128xf32>
      tpu.vector_store %arg6[%62, %c0_26], %61 {strides = array<i32>} : memref<32x128xf32, #tpu.memory_space<vmem>>, vector<1x128xf32>,
      %c6_i32 = arith.constant 6 : i32
      %64 = arith.addi %15, %c6_i32 : i32
      %65 = arith.addi %0, %64 : i32
      %66 = arith.index_cast %65 : i32 to index
      %67 = memref.load %arg1[%66] : memref<64xi32, #tpu.memory_space<smem>>
      %68 = arith.index_cast %67 : i32 to index
      %c0_27 = arith.constant 0 : index
      %69 = vector.load %arg5[%68, %c0_27] : memref<512x128xf32, #tpu.memory_space<vmem>>, vector<1x128xf32>
      %70 = arith.index_cast %64 : i32 to index
      %c0_28 = arith.constant 0 : index
      %71 = vector.load %arg6[%70, %c0_28] : memref<32x128xf32, #tpu.memory_space<vmem>>, vector<1x128xf32>
      tpu.vector_store %arg6[%70, %c0_28], %69 {strides = array<i32>} : memref<32x128xf32, #tpu.memory_space<vmem>>, vector<1x128xf32>,
      %c7_i32 = arith.constant 7 : i32
      %72 = arith.addi %15, %c7_i32 : i32
      %73 = arith.addi %0, %72 : i32
      %74 = arith.index_cast %73 : i32 to index
      %75 = memref.load %arg1[%74] : memref<64xi32, #tpu.memory_space<smem>>
      %76 = arith.index_cast %75 : i32 to index
      %c0_29 = arith.constant 0 : index
      %77 = vector.load %arg5[%76, %c0_29] : memref<512x128xf32, #tpu.memory_space<vmem>>, vector<1x128xf32>
      %78 = arith.index_cast %72 : i32 to index
      %c0_30 = arith.constant 0 : index
      %79 = vector.load %arg6[%78, %c0_30] : memref<32x128xf32, #tpu.memory_space<vmem>>, vector<1x128xf32>
      tpu.vector_store %arg6[%78, %c0_30], %77 {strides = array<i32>} : memref<32x128xf32, #tpu.memory_space<vmem>>, vector<1x128xf32>,
    }
    %c4_i32_0 = arith.constant 4 : i32
    %c0 = arith.constant 0 : index
    %c0_1 = arith.constant 0 : index
    %2 = vector.load %arg6[%c0, %c0_1] : memref<32x128xf32, #tpu.memory_space<vmem>>, vector<32x128xf32>
    %c127_i32 = arith.constant 127 : i32
    %3 = tpu.dynamic_rotate %2 by %c127_i32 dim 1 : vector<32x128xf32>, i32 -> vector<32x128xf32>
    %c1_i32_2 = arith.constant 1 : i32
    %4 = tpu.dynamic_rotate %2 by %c1_i32_2 dim 1 : vector<32x128xf32>, i32 -> vector<32x128xf32>
    %c0_3 = arith.constant 0 : index
    %c0_4 = arith.constant 0 : index
    %5 = vector.load %arg2[%c0_3, %c0_4] : memref<32x128xf32, #tpu.memory_space<vmem>>, vector<32x128xf32>
    %6 = arith.mulf %2, %5 : vector<32x128xf32>
    %c0_5 = arith.constant 0 : index
    %c0_6 = arith.constant 0 : index
    %7 = vector.load %arg3[%c0_5, %c0_6] : memref<32x128xf32, #tpu.memory_space<vmem>>, vector<32x128xf32>
    %8 = arith.mulf %3, %7 : vector<32x128xf32>
    %9 = arith.addf %6, %8 : vector<32x128xf32>
    %c0_7 = arith.constant 0 : index
    %c0_8 = arith.constant 0 : index
    %10 = vector.load %arg4[%c0_7, %c0_8] : memref<32x128xf32, #tpu.memory_space<vmem>>, vector<32x128xf32>
    %11 = arith.mulf %4, %10 : vector<32x128xf32>
    %12 = arith.addf %9, %11 : vector<32x128xf32>
    %c0_9 = arith.constant 0 : index
    %c0_10 = arith.constant 0 : index
    %13 = vector.load %arg6[%c0_9, %c0_10] : memref<32x128xf32, #tpu.memory_space<vmem>>, vector<32x128xf32>
    tpu.vector_store %arg6[%c0_9, %c0_10], %12 {strides = array<i32>} : memref<32x128xf32, #tpu.memory_space<vmem>>, vector<32x128xf32>,
    return
  }
  func.func @transform_0(%arg0: i32, %arg1: memref<64xi32, #tpu.memory_space<smem>>) -> (i32, i32) {
    %c0_i32 = arith.constant 0 : i32
    %c0_i32_0 = arith.constant 0 : i32
    %c0_i32_1 = arith.constant 0 : i32
    return %c0_i32, %c0_i32_0 : i32, i32
  }
  func.func @transform_1(%arg0: i32, %arg1: memref<64xi32, #tpu.memory_space<smem>>) -> (i32, i32) {
    %c0_i32 = arith.constant 0 : i32
    %c0_i32_0 = arith.constant 0 : i32
    %c0_i32_1 = arith.constant 0 : i32
    return %c0_i32, %c0_i32_0 : i32, i32
  }
  func.func @transform_2(%arg0: i32, %arg1: memref<64xi32, #tpu.memory_space<smem>>) -> (i32, i32) {
    %c0_i32 = arith.constant 0 : i32
    %c0_i32_0 = arith.constant 0 : i32
    %c0_i32_1 = arith.constant 0 : i32
    return %c0_i32, %c0_i32_0 : i32, i32
  }
  func.func @transform_3(%arg0: i32, %arg1: memref<64xi32, #tpu.memory_space<smem>>) -> (i32, i32) {
    %c0_i32 = arith.constant 0 : i32
    %c0_i32_0 = arith.constant 0 : i32
    %c0_i32_1 = arith.constant 0 : i32
    return %c0_i32, %c0_i32_0 : i32, i32
  }
  func.func @transform_4(%arg0: i32, %arg1: memref<64xi32, #tpu.memory_space<smem>>) -> (i32, i32) {
    %c0_i32 = arith.constant 0 : i32
    %c0_i32_0 = arith.constant 0 : i32
    return %arg0, %c0_i32 : i32, i32
  }
}

</mosaic_0001>

<bundles_post_ra>
// kernel: tpu_custom_call.1
= control target key start
LH: loop header
LB: loop body
LE: loop exit
PB: predicated region body
PF: predicated region fallthrough
CT: control target
= control target key end

     0   :  { %s826_s18 = smov [#allocation3]   ;;  %s1098_s0 = inlined_call_operand.hbm [shape: s32[64], index: 0, kind: input, shape index: {}]   ;;  %s1099_s1 = inlined_call_operand.hbm [shape: f32[32,128], index: 1, kind: input, shape index: {}]   ;;  %s1100_s2 = inlined_call_operand.hbm [shape: f32[32,128], index: 2, kind: input, shape index: {}]   ;;  %s1101_s3 = inlined_call_operand.hbm [shape: f32[32,128], index: 3, kind: input, shape index: {}]   ;;  %s1102_s4 = inlined_call_operand.hbm [shape: f32[512,128], index: 4, kind: input, shape index: {}]   ;;  %s1103_s5 = inlined_call_operand.hbm [shape: f32[64,128], index: 5, kind: output, shape index: {}]  }
   0x1   :  { %1105 = sst [smem:[#allocation18_spill]] %s1099_s1 }
   0x2   :  { %1106 = sst [smem:[#allocation19_spill]] %s1100_s2 }
   0x3   :  { %1107 = sst [smem:[#allocation20_spill]] %s1101_s3 }
   0x4   :  { %1108 = sst [smem:[#allocation21_spill]] %s1102_s4 }
   0x5   :  { %11 = dma.hbm_to_smem %s1098_s0, 16, %s826_s18, [#allocation2] }
   0x6   :  { %788 = dma.done.wait [#allocation2], 16 }
   0x7   :  { %789 = vsyncadd [#allocation2], 4294967280 }
   0x8   :  { %13 = sfence }
   0x9   :  { %14 = vsyncpa [#allocation5], 0 }
   0xa   :  { %15 = vsyncpa [#allocation8], 0 }
   0xb   :  { %16 = vsyncpa [#allocation11], 0 }
   0xc   :  { %17 = vsyncpa [#allocation6], 0 }
   0xd   :  { %19 = vsyncpa [#allocation6 + $0x1], 0  ;;  %s871_s21 = smov 0   ;;  %s873_s22 = smov 0  }
   0xe   :  { %s875_s23 = smov 0   ;;  %s877_s24 = smov 0  }
   0xf LB: > { %s892_s0 = sadd.s32 4294967295, %s820_s24   ;;  %s501_s25 = sadd.s32 4294967294, %s820_s24   ;;  %s820_s24 = sphi %s877_s24, %s1121_s24   ;;  %s816_s23 = sphi %s875_s23, %s1120_s23   ;;  %s812_s22 = sphi %s873_s22, %s1119_s22   ;;  %s808_s21 = sphi %s871_s21, %s1118_s21  }
  0x10   : > { %s896_s26 = sadd.s32 1, %s820_s24   ;;  %s116_s27 = sadd.s32 1, %s816_s23 }
  0x11   : > { %s113_s28 = ssub.s32 %s820_s24, %s896_s26  ;;  %p126_p0 = scmp.ne.s32.totalorder %s816_s23, %s812_s22 }
  0x12   : > { %p114_p1 = scmp.eq.s32.totalorder %s113_s28, 0  ;;  %p127_p2 = scmp.eq.s32.totalorder %s892_s0, 1 }
  0x13   : > { %p132_p3 = scmp.ne.s32.totalorder %s812_s22, %s808_s21  ;;  %p133_p4 = scmp.eq.s32.totalorder %s501_s25, 1 }
  0x14   : > { %s907_s29 = scalar_select %p114_p1, %s816_s23, %s116_s27  }
  0x15   : > { %p909_p5 = por %p127_p2, %p126_p0  ;;  %p913_p6 = por %p133_p4, %p132_p3 }
  0x16   : > { %p502_p7 = scmp.ge.s32.totalorder %s820_s24, 1  ;;  %p140_p8 = scmp.lt.s32.totalorder %s820_s24, 3 }
  0x17   : > { %p570_p9 = scmp.eq.s32.totalorder %s892_s0, 0  ;;  %s827_s8 = smov [#allocation7]  }
  0x18   : > { %p920_p10 = pnand %p502_p7, %p140_p8  ;;  %s165_s9 = sshll.u32 %s827_s8, 4  ;;  %s166_s9 = int_to_ptr.vmem [resolvable:$true] %s165_s9 }
  0x19   : > { %s828_s11 = smov [#allocation4]   ;;  %s829_s13 = smov [#allocation9]  }
  0x1a   : > { %p553_p11 = pneg %p920_p10  ;;  %s152_s12 = sshll.u32 %s828_s11, 4  ;;  %s153_s12 = int_to_ptr.vmem [resolvable:$true] %s152_s12 }
  0x1b   : > { %s178_s14 = sshll.u32 %s829_s13, 4  ;;  %s649_s15 = scalar_lea.vmem %s166_s9, 512  ;;  %s179_s14 = int_to_ptr.vmem [resolvable:$true] %s178_s14 }
  0x1c   : > { %p928_p12 = pnand %p570_p9, %p553_p11  ;;  %p650_p0 = scmp.ne.s32.totalorder %s166_s9, %s649_s15 }
  0x1d   : > { %p657_p3 = scmp.lt.s32.totalorder %s166_s9, %s166_s9  ;;  %p658_p4 = scmp.lt.s32.totalorder %s649_s15, %s649_s15 }
  0x1e   : > { %p640_p13 = pneg %p928_p12 }
  0x1f   : > { %p659_p7 = por %p658_p4, %p657_p3 }
  0x20   : > { %p652_p1 = pnand %p650_p0, %p640_p13 }
  0x22   : > { %p653_p2 = pneg %p652_p1 }
  0x24   : > { %p660_p8 = pnand %p659_p7, %p653_p2 }
  0x26   : > { %663 = shalt.err (!%p660_p8)
}
  0x27   : > { %s830_s16 = smov 128   ;;  %s831_s17 = smov 8  }
  0x28   : > { %s1113_s2 = sld [smem:[#allocation19_spill]]  ;;  %s675_s20 = scalar_lea.vmem %s153_s12, 512 }
  0x29   : > { %p676_p11 = scmp.ne.s32.totalorder %s153_s12, %s675_s20  ;;  %p683_p2 = scmp.lt.s32.totalorder %s153_s12, %s153_s12 }
  0x2a   : > { %p684_p3 = scmp.lt.s32.totalorder %s675_s20, %s675_s20 }
  0x2b   : > { %p678_p0 = pnand %p676_p11, %p640_p13 }
  0x2c   : > { %p685_p4 = por %p684_p3, %p683_p2 }
  0x2d   : > { %p679_p1 = pneg %p678_p0 }
  0x2e   : > { %559 = dma.hbm_to_vmem [thread:$0]  (!%p928_p12), %s1113_s2, 512, %s166_s9, [#allocation8], %s830_s16, %s830_s16, %s831_s17  }
  0x2f   : > { %p686_p7 = pnand %p685_p4, %p679_p1 }
  0x31   : > { %689 = shalt.err (!%p686_p7)
}
  0x32   : > { %s1114_s1 = sld [smem:[#allocation18_spill]]  ;;  %s701_s28 = scalar_lea.vmem %s179_s14, 512 }
  0x33   : > { %p702_p8 = scmp.ne.s32.totalorder %s179_s14, %s701_s28  ;;  %p709_p2 = scmp.lt.s32.totalorder %s179_s14, %s179_s14 }
  0x34   : > { %p710_p1 = scmp.lt.s32.totalorder %s701_s28, %s701_s28 }
  0x35   : > { %p704_p11 = pnand %p702_p8, %p640_p13 }
  0x36   : > { %p711_p3 = por %p710_p1, %p709_p2 }
  0x37   : > { %p705_p0 = pneg %p704_p11 }
  0x38   : > { %556 = dma.hbm_to_vmem [thread:$0]  (!%p928_p12), %s1114_s1, 512, %s153_s12, [#allocation5], %s830_s16, %s830_s16, %s831_s17  }
  0x39   : > { %p712_p4 = pnand %p711_p3, %p705_p0 }
  0x3b   : > { %715 = shalt.err (!%p712_p4)
}
  0x3c   : > { %s1115_s3 = sld [smem:[#allocation20_spill]]  ;;  %s832_s11 = smov [#allocation10]  }
  0x3d   : > { %s191_s12 = sshll.u32 %s832_s11, 4  ;;  %s192_s12 = int_to_ptr.vmem [resolvable:$true] %s191_s12 }
  0x3e   : > { %s727_s13 = scalar_lea.vmem %s192_s12, 8192  ;;  %p735_p0 = scmp.lt.s32.totalorder %s192_s12, %s192_s12 }
  0x3f   : > { %p728_p7 = scmp.ne.s32.totalorder %s192_s12, %s727_s13  ;;  %p736_p2 = scmp.lt.s32.totalorder %s727_s13, %s727_s13 }
  0x41   : > { %p730_p8 = pnand %p728_p7, %p640_p13  ;;  %p737_p1 = por %p736_p2, %p735_p0 }
  0x42   : > { %562 = dma.hbm_to_vmem [thread:$0]  (!%p928_p12), %s1115_s3, 512, %s179_s14, [#allocation8], %s830_s16, %s830_s16, %s831_s17  }
  0x43   : > { %p731_p11 = pneg %p730_p8 }
  0x45   : > { %p738_p3 = pnand %p737_p1, %p731_p11 }
  0x47   : > { %741 = shalt.err (!%p738_p3)
}
  0x48   : > { %s1116_s4 = sld [smem:[#allocation21_spill]] }
  0x4a   : > { %207 = sbr.rel (%p920_p10) target bundleno = 263 (0x107), region = 36 }
  0x4e   : > { %565 = dma.hbm_to_vmem [thread:$0]  (!%p928_p12), %s1116_s4, 8192, %s192_s12, [#allocation11], %s830_s16, %s830_s16, %s831_s17  }
  0x4f   : > { %791 = dma.done.wait (%p570_p9), [#allocation5], 512  }
  0x50   : > { %793 = vsyncadd (%p570_p9), [#allocation5], 4294966784 }
  0x51   : > { %795 = dma.done.wait (%p570_p9), [#allocation8], 1024  }
  0x52   : > { %797 = vsyncadd (%p570_p9), [#allocation8], 4294966272 }
  0x53   : > { %799 = dma.done.wait (%p570_p9), [#allocation11], 8192  }
  0x54   : > { %801 = vsyncadd (%p570_p9), [#allocation11], 4294959104  ;;  %s1104_s7 = sand.u32 1, %s812_s22   ;;  %s994_s10 = sshll.u32 %s892_s0, 5 }
  0x55   : > { %s512_s16 = sshll.u32 %s1104_s7, 5  ;;  %s1000_s18 = smov 0  }
  0x56   : > { %s998_s17 = scalar_lea.vmem [#allocation12], %s512_s16 }
  0x57 LB: >> { %s1006_s19 = sshll.u32 %s824_s18, 3  ;;  %s247_s18 = sadd.s32 1, %s824_s18   ;;  %s824_s18 = sphi %s1000_s18, %s247_s18  }
  0x58   : >> { %s249_s20 = sadd.s32 %s1006_s19, %s994_s10  ;;  %s1012_s25 = scalar_lea.vmem %s998_s17, %s1006_s19 [#allocation12] }
  0x59   : >> { %s250_s27 = sld [smem:[#allocation3 + %s249_s20]]  ;;  %s255_s28 = sadd.s32 1, %s1006_s19 }
  0x5a   : >> { %s256_s8 = sadd.s32 %s994_s10, %s255_s28  ;;  %s262_s9 = sadd.s32 2, %s1006_s19 }
  0x5b   : >> { %s257_s11 = sld [smem:[#allocation3 + %s256_s8]]  ;;  %s263_s12 = sadd.s32 %s994_s10, %s262_s9 }
  0x5c   : >> { %s264_s13 = sld [smem:[#allocation3 + %s263_s12]]  ;;  %s269_s14 = sadd.s32 3, %s1006_s19 }
  0x5d   : >> { %s270_s15 = sadd.s32 %s994_s10, %s269_s14  ;;  %s276_s16 = sadd.s32 4, %s1006_s19 }
  0x5e   : >> { %s271_s7 = sld [smem:[#allocation3 + %s270_s15]]  ;;  %s277_s1 = sadd.s32 %s994_s10, %s276_s16 }
  0x5f   : >> { %s278_s2 = sld [smem:[#allocation3 + %s277_s1]]  ;;  %s251_s20 = scalar_lea.vmem [#allocation10], %s250_s27 }
  0x60   : >> { %v252_v0 = vld [vmem:[%s251_s20] sm:$0x1]  ;;  %s283_s3 = sadd.s32 5, %s1006_s19  ;;  %s290_s28 = sadd.s32 6, %s1006_s19 }
  0x61   : >> { %254 = vst [vmem:[%s1012_s25] sm:$0x1] %v252_v0  ;;  %s284_s8 = sadd.s32 %s994_s10, %s283_s3  ;;  %s258_s9 = scalar_lea.vmem [#allocation10], %s257_s11 }
  0x62   : >> { %v259_v1 = vld [vmem:[%s258_s9] sm:$0x1]  ;;  %s285_s12 = sld [smem:[#allocation3 + %s284_s8]]  ;;  %s265_s14 = scalar_lea.vmem [#allocation10], %s264_s13 }
  0x63   : >> { %516 = vst [vmem:[%s1012_s25 + $0x1] sm:$0x1] %v259_v1  ;;  %v266_v2 = vld [vmem:[%s265_s14] sm:$0x1]  ;;  %s291_s15 = sadd.s32 %s994_s10, %s290_s28  ;;  %s297_s16 = sadd.s32 7, %s1006_s19 }
  0x64   : >> { %518 = vst [vmem:[%s1012_s25 + $0x2] sm:$0x1] %v266_v2  ;;  %s292_s1 = sld [smem:[#allocation3 + %s291_s15]]  ;;  %s272_s27 = scalar_lea.vmem [#allocation10], %s271_s7 }
  0x65   : >> { %v273_v3 = vld [vmem:[%s272_s27] sm:$0x1]  ;;  %s298_s20 = sadd.s32 %s994_s10, %s297_s16  ;;  %s279_s4 = scalar_lea.vmem [#allocation10], %s278_s2 }
  0x66   : >> { %520 = vst [vmem:[%s1012_s25 + $0x3] sm:$0x1] %v273_v3  ;;  %v280_v4 = vld [vmem:[%s279_s4] sm:$0x1]  ;;  %s299_s3 = sld [smem:[#allocation3 + %s298_s20]]  ;;  %p244_p9 = scmp.ge.s32.totalorder %s247_s18, 4  }
  0x67   : >> { %522 = vst [vmem:[%s1012_s25 + $0x4] sm:$0x1] %v280_v4  ;;  %s833_s2 = smov (%p244_p9), 127   ;;  %s834_s4 = smov (%p244_p9), 1   ;;  %v324_v14 = vld [vmem:[#allocation4] sm:$0xff] (%p244_p9)  ;;  %v325_v16 = vld [vmem:[#allocation4 + $0x8] sm:$0xff] (%p244_p9) }
  0x68   : >> { %s286_s11 = scalar_lea.vmem [#allocation10], %s285_s12  ;;  %v332_v15 = vld [vmem:[#allocation7] sm:$0xff] (%p244_p9)  ;;  %v333_v17 = vld [vmem:[#allocation7 + $0x8] sm:$0xff] (%p244_p9)  ;;  %v326_v22 = vld [vmem:[#allocation4 + $0x10] sm:$0xff] (%p244_p9)  ;;  %s534_s7 = sshll.u32 (%p244_p9), %s892_s0, 9 }
  0x69   : >> { %v287_v5 = vld [vmem:[%s286_s11] sm:$0x1]  ;;  %v334_v23 = vld [vmem:[#allocation7 + $0x10] sm:$0xff] (%p244_p9)  ;;  %v327_v24 = vld [vmem:[#allocation4 + $0x18] sm:$0xff] (%p244_p9)  ;;  %s374_s10 = sshll.u32 (%p244_p9), %s998_s17, 4  ;;  %s1117_s0 = sand.u32 (%p244_p9), 1, %s812_s22   ;;  %s1052_s10 = int_to_ptr.vmem [resolvable:$true] %s374_s10 }
  0x6a   : >> { %524 = vst [vmem:[%s1012_s25 + $0x5] sm:$0x1] %v287_v5  ;;  %s293_s13 = scalar_lea.vmem [#allocation10], %s292_s1  ;;  %246 = sbr.rel (!%p244_p9) target bundleno = 87 (0x57), region = 108  ;;  %v335_v27 = vld [vmem:[#allocation7 + $0x18] sm:$0xff] (%p244_p9)  ;;  %v345_v28 = vld [vmem:[#allocation9 + $0x8] sm:$0xff] (%p244_p9) }
  0x6b   : >> { %v294_v6 = vld [vmem:[%s293_s13] sm:$0x1]  ;;  %v347_v40 = vld [vmem:[#allocation9 + $0x18] sm:$0xff] (%p244_p9)  ;;  %v346_v41 = vld [vmem:[#allocation9 + $0x10] sm:$0xff] (%p244_p9)  ;;  %s1058_s8 = scalar_lea.sflag (%p244_p9), [#allocation6], %s1117_s0  ;;  %s742_s9 = scalar_lea.vmem (%p244_p9), %s1052_s10, 512 }
  0x6c   : >> { %526 = vst [vmem:[%s1012_s25 + $0x6] sm:$0x1] %v294_v6  ;;  %s300_s28 = scalar_lea.vmem [#allocation10], %s299_s3  ;;  %v344_v29 = vld [vmem:[#allocation9] sm:$0xff] (%p244_p9)  ;;  %p743_p10 = scmp.ne.s32.totalorder (%p244_p9), %s1052_s10, %s742_s9 }
  0x6d   : >> { %v301_v7 = vld [vmem:[%s300_s28] sm:$0x1]  ;;  %s835_s12 = smov (%p244_p9), [#allocation12]  }
  0x6e   : >> { %528 = vst [vmem:[%s1012_s25 + $0x7] sm:$0x1] %v301_v7  ;;  %s1050_s25 = scalar_lea.hbm (%p244_p9), %s1103_s5, %s534_s7  ;;  %p744_p12 = pnand (%p244_p9), %p743_p10, %p909_p5 }
  0x6f   : > { %s746_s14 = sshll.u32 %s835_s12, 4  ;;  %s747_s14 = int_to_ptr.vmem [resolvable:$false] %s746_s14 }
  0x70   : > { %p745_p13 = pneg %p744_p12  ;;  %s748_s15 = scalar_lea.vmem %s747_s14, 1024 }
  0x71   : > { %p749_p4 = scmp.lt.s32.totalorder %s1052_s10, %s747_s14  ;;  %p750_p7 = scmp.lt.s32.totalorder %s748_s15, %s742_s9 }
  0x73   : > { %p751_p8 = por %p750_p7, %p749_p4 }
  0x75   : > { %v306_v8 = vld [vmem:[%s998_s17 + $0x10] sm:$0xff]  ;;  %v304_v9 = vld [vmem:[%s998_s17] sm:$0xff]  ;;  %v307_v10 = vld [vmem:[%s998_s17 + $0x18] sm:$0xff]  ;;  %p752_p11 = pnand %p751_p8, %p745_p13 }
  0x76   : > { %312 = vrot.lane.b32.xlu1 %v306_v8, %s833_s2  ;;  %308 = vrot.lane.b32.xlu0 %v304_v9, %s833_s2  ;;  %v305_v11 = vld [vmem:[%s998_s17 + $0x8] sm:$0xff]  ;;  %v328_v18 = vmul.f32 %v324_v14, %v304_v9  ;;  %v330_v30 = vmul.f32 %v326_v22, %v306_v8  ;;  %v331_v33 = vmul.f32 %v327_v24, %v307_v10 }
  0x77   : > { %v329_v25 = vmul.f32 %v325_v16, %v305_v11 }
  0x7a   : > { %314 = vrot.lane.b32.xlu1 %v307_v10, %s833_s2  ;;  %310 = vrot.lane.b32.xlu0 %v305_v11, %s833_s2 }
  0x7e   : > { %318 = vrot.lane.b32.xlu1 %v305_v11, %s834_s4  ;;  %316 = vrot.lane.b32.xlu0 %v304_v9, %s834_s4 }
  0x82   : > { %322 = vrot.lane.b32.xlu1 %v307_v10, %s834_s4  ;;  %320 = vrot.lane.b32.xlu0 %v306_v8, %s834_s4 }
  0xe8   : > { %v313_v12 = vpop.permute.xlu1 %312  ;;  %v309_v13 = vpop.permute.xlu0 %308 }
  0xe9   : > { %v336_v19 = vmul.f32 %v332_v15, %v309_v13  ;;  %v338_v31 = vmul.f32 %v334_v23, %v313_v12 }
  0xeb   : > { %v340_v32 = vadd.f32 %v336_v19, %v328_v18  ;;  %v342_v46 = vadd.f32 %v338_v31, %v330_v30 }
  0xec   : > { %v315_v20 = vpop.permute.xlu1 %314  ;;  %v311_v21 = vpop.permute.xlu0 %310 }
  0xed   : > { %v337_v26 = vmul.f32 %v333_v17, %v311_v21  ;;  %v339_v36 = vmul.f32 %v335_v27, %v315_v20 }
  0xef   : > { %v341_v37 = vadd.f32 %v337_v26, %v329_v25  ;;  %v343_v47 = vadd.f32 %v339_v36, %v331_v33 }
  0xf0   : > { %v319_v34 = vpop.permute.xlu1 %318  ;;  %v317_v35 = vpop.permute.xlu0 %316 }
  0xf1   : > { %v349_v38 = vmul.f32 %v345_v28, %v319_v34  ;;  %v348_v39 = vmul.f32 %v344_v29, %v317_v35 }
  0xf3   : > { %v353_v42 = vadd.f32 %v349_v38, %v341_v37  ;;  %v352_v43 = vadd.f32 %v348_v39, %v340_v32 }
  0xf4   : > { %v323_v44 = vpop.permute.xlu1 %322  ;;  %v321_v45 = vpop.permute.xlu0 %320 }
  0xf5   : > { %357 = vst [vmem:[%s998_s17 + $0x8] sm:$0xff] %v353_v42  ;;  %356 = vst [vmem:[%s998_s17] sm:$0xff] %v352_v43  ;;  %v351_v48 = vmul.f32 %v347_v40, %v323_v44  ;;  %v350_v49 = vmul.f32 %v346_v41, %v321_v45 }
  0xf7   : > { %v355_v50 = vadd.f32 %v351_v48, %v343_v47  ;;  %v354_v51 = vadd.f32 %v350_v49, %v342_v46 }
  0xf9   : > { %359 = vst [vmem:[%s998_s17 + $0x18] sm:$0xff] %v355_v50  ;;  %358 = vst [vmem:[%s998_s17 + $0x10] sm:$0xff] %v354_v51 }
  0xfa   : > { %755 = shalt.err (!%p752_p11)
}
  0xfb   : > { %s756_s17 = scalar_lea.hbm %s1050_s25, 512  ;;  %s760_s27 = scalar_lea.hbm %s1103_s5, 1024 }
  0xfc   : > { %p757_p0 = scmp.ne.s32.totalorder %s1050_s25, %s756_s17  ;;  %p761_p3 = scmp.lt.s32.totalorder %s1050_s25, %s1103_s5 }
  0xfd   : > { %p762_p9 = scmp.lt.s32.totalorder %s760_s27, %s756_s17 }
  0xfe   : > { %p758_p2 = pnand %p757_p0, %p909_p5 }
  0xff   : > { %p763_p10 = por %p762_p9, %p761_p3 }
 0x100   : > { %p759_p1 = pneg %p758_p2 }
 0x102   : > { %p764_p12 = pnand %p763_p10, %p759_p1 }
 0x104   : > { %767 = shalt.err (!%p764_p12)
}
 0x105   : > { %s836_s11 = smov 128   ;;  %s837_s13 = smov 8  }
 0x106   : > { %551 = dma.vmem_to_hbm [thread:$0]  (%p909_p5), %s1052_s10, 512, %s1050_s25, %s1058_s8, %s836_s11, %s836_s11, %s837_s13  }
 0x107 PF: > { %p578_p13 = scmp.ge.s32.totalorder %s820_s24, 2  ;;  %s389_s28 = sand.u32 1, %s808_s21  }
 0x108   : > { %s390_s2 = scalar_lea.sflag [#allocation6], %s389_s28 }
 0x109   : > { %p567_p4 = pnand %p578_p13, %p913_p6 }
 0x10b   : > { %p568_p7 = pneg %p567_p4 }
 0x10d   : > { %803 = dma.done.wait (%p568_p7), %s390_s2, 512  }
 0x10e   : > { %805 = vsyncadd (%p568_p7), %s390_s2, 4294966784  ;;  %p22_p8 = scmp.ge.s32.totalorder %s896_s26, 4   ;;  %s1118_s21 = smov %s812_s22 }
 0x10f   : > { %s1119_s22 = smov %s816_s23  ;;  %s1120_s23 = smov %s907_s29 }
 0x110   : > { %s1121_s24 = smov %s896_s26  ;;  %24 = sbr.rel (!%p22_p8) target bundleno = 15 (0xf), region = 119 }
 0x115   :  { %395 = vsyncpa [#allocation5], 1 }
 0x116   :  { %397 = vsyncpa [#allocation5 + $0x1], 1 }
 0x117   :  { %398 = vsyncpa [#allocation8], 1 }
 0x118   :  { %399 = vsyncpa [#allocation11], 1 }
 0x119   :  { %400 = vsyncpa [#allocation6], 1 }
 0x11a   :  { %402 = vsyncpa [#allocation6 + $0x1], 1 }

</bundles_post_ra>
